<compile_context>
chip_gen: v7x
topology: tpu7x:2x2x1
jax: 0.10.0
libtpu: 0.0.40
codegen_flags: <defaults>
</compile_context>

<pallas_src>
import jax
import jax.numpy as jnp
from jax.experimental import pallas as pl
from jax.experimental.pallas import tpu as pltpu


NEG_BIG = -1e30  # Python float (wrapper-side only) — never captured inside a kernel.


def _round_up(x: int, m: int) -> int:
    return ((x + m - 1) // m) * m


def _row_tile(n: int) -> int:
    """Row-tile height over N = B*T.

    Large, 256-aligned tiles amortize the per-grid-step overhead (the kernel is
    HBM-writeback bound), capped at 1024 rows so the (TM, VP) f32 temporaries and the
    double-buffered output tile stay well under every generation's scoped-VMEM default.
    When one tile would cover everything, split into >=2 tiles so v7x's two TensorCores
    both get work (the row axis is marked "parallel").
    """
    if n < 256:
        return _round_up(max(n, 1), 8)
    tm = min(1024, _round_up(n, 256))
    if _round_up(n, tm) // tm < 2:
        tm = max(256, _round_up((n + 1) // 2, 256))
    return tm


def _gather_logits(idx_ref, table_ref, tm: int, vp: int):
    """Embedding lookup as exact one-hot @ table on the MXU (f32, lane-dense K=vp)."""
    idx = idx_ref[...]                                           # (tm, 1) int32
    cols = jax.lax.broadcasted_iota(jnp.int32, (tm, vp), 1)      # (tm, vp)
    onehot = (cols == idx).astype(jnp.float32)                   # (tm, vp)
    logits = jnp.dot(onehot, table_ref[...],
                     preferred_element_type=jnp.float32,
                     precision=jax.lax.Precision.HIGHEST)        # exact gather in f32
    return cols, logits


def _tile_loss_sum(cols, logits, tgt_ref, n: int, tm: int):
    """Partial (unnormalized) cross-entropy sum for this row tile."""
    # Padded vocab columns already hold -1e30 (from the table padding), so the
    # logsumexp over the full lane-dense width is correct without an extra select.
    m = jnp.max(logits, axis=-1, keepdims=True)                  # (tm, 1)
    lse = m + jnp.log(jnp.sum(jnp.exp(logits - m), axis=-1, keepdims=True))

    tgt = tgt_ref[...]                                           # (tm, 1) int32
    picked = jnp.sum(jnp.where(cols == tgt, logits, 0.0), axis=-1, keepdims=True)

    rows = jax.lax.broadcasted_iota(jnp.int32, (tm, 1), 0) + pl.program_id(0) * tm
    per_row = jnp.where(rows < n, lse - picked, 0.0)             # mask padded rows
    return jnp.sum(per_row)


def _make_train_kernel(n: int, tm: int, vp: int):
    """Logits tile + partial cross-entropy sum for that tile."""

    def kernel(idx_ref, tgt_ref, table_ref, logits_ref, loss_ref):
        cols, logits = _gather_logits(idx_ref, table_ref, tm, vp)
        logits_ref[...] = logits                                 # lane-dense full-width vst
        loss_ref[0, 0] = _tile_loss_sum(cols, logits, tgt_ref, n, tm)

    return kernel


def _make_loss_kernel(n: int, tm: int, vp: int):
    """Loss-only variant: no logits writeback (the dominant HBM traffic)."""

    def kernel(idx_ref, tgt_ref, table_ref, loss_ref):
        cols, logits = _gather_logits(idx_ref, table_ref, tm, vp)
        loss_ref[0, 0] = _tile_loss_sum(cols, logits, tgt_ref, n, tm)

    return kernel


def _make_logits_kernel(tm: int, vp: int):
    """target=None path: embedding gather only."""

    def kernel(idx_ref, table_ref, logits_ref):
        _, logits = _gather_logits(idx_ref, table_ref, tm, vp)
        logits_ref[...] = logits

    return kernel


def _pad_ids(ids_flat, n: int, n_pad: int):
    return jnp.pad(ids_flat.reshape(n, 1).astype(jnp.int32), ((0, n_pad - n), (0, 0)))


def _pad_table(table, v: int, vp: int):
    t = table.astype(jnp.float32)
    if vp > v:
        # Vocab-pad columns get -1e30 (finite: avoids inf-inf/NaN in the max/exp path and
        # keeps the one-hot multiply for `picked` safe).  Pad rows are never gathered
        # (padded token ids are 0), so zero rows are fine.
        t = jnp.pad(t, ((0, 0), (0, vp - v)), constant_values=NEG_BIG)
        t = jnp.pad(t, ((0, vp - v), (0, 0)))
    return t


def _sizes(B: int, T: int, V: int):
    N = B * T
    VP = _round_up(V, 128)
    TM = _row_tile(N)
    NP = _round_up(N, TM)
    return N, VP, TM, NP, NP // TM


@jax.jit
def bigram_forward(idx, target, table):
    """idx, target: (B, T) int; table: (V, V) f32.

    Returns (logits (B*T, V) f32, loss () f32) — matches the PyTorch forward with target.
    """
    B, T = idx.shape
    V = table.shape[0]
    N, VP, TM, NP, num_tiles = _sizes(B, T, V)

    idx_col = _pad_ids(idx.reshape(N), N, NP)
    tgt_col = _pad_ids(target.reshape(N), N, NP)
    table_p = _pad_table(table, V, VP)

    logits_p, partial = pl.pallas_call(
        _make_train_kernel(n=N, tm=TM, vp=VP),
        out_shape=(
            jax.ShapeDtypeStruct((NP, VP), jnp.float32),
            jax.ShapeDtypeStruct((num_tiles, 1), jnp.float32),
        ),
        grid=(num_tiles,),
        in_specs=[
            pl.BlockSpec((TM, 1), lambda i: (i, 0)),        # token ids
            pl.BlockSpec((TM, 1), lambda i: (i, 0)),        # targets
            pl.BlockSpec((VP, VP), lambda i: (0, 0)),       # table (resident)
        ],
        out_specs=(
            pl.BlockSpec((TM, VP), lambda i: (i, 0)),       # lane-dense logits tile
            pl.BlockSpec((1, 1), lambda i: (i, 0),
                         memory_space=pltpu.MemorySpace.SMEM),  # per-tile loss sum
        ),
        compiler_params=pltpu.CompilerParams(dimension_semantics=("parallel",)),
        cost_estimate=pl.CostEstimate(
            flops=2 * NP * VP * VP + 8 * NP * VP,
            transcendentals=NP * VP,
            bytes_accessed=4 * (VP * VP + NP * VP + 2 * NP + num_tiles),
        ),
    )(idx_col, tgt_col, table_p)

    # NOTE: this slice is an extra HBM pass over all logits; callers that can consume the
    # padded (NP, VP) slab (or only need the loss -> bigram_loss) should skip it.
    logits = logits_p[:N, :V]
    loss = jnp.sum(partial) / jnp.float32(N)
    return logits, loss


@jax.jit
def bigram_loss(idx, target, table):
    """Loss-only train-step path: identical loss, no logits HBM writeback."""
    B, T = idx.shape
    V = table.shape[0]
    N, VP, TM, NP, num_tiles = _sizes(B, T, V)

    idx_col = _pad_ids(idx.reshape(N), N, NP)
    tgt_col = _pad_ids(target.reshape(N), N, NP)
    table_p = _pad_table(table, V, VP)

    partial = pl.pallas_call(
        _make_loss_kernel(n=N, tm=TM, vp=VP),
        out_shape=jax.ShapeDtypeStruct((num_tiles, 1), jnp.float32),
        grid=(num_tiles,),
        in_specs=[
            pl.BlockSpec((TM, 1), lambda i: (i, 0)),
            pl.BlockSpec((TM, 1), lambda i: (i, 0)),
            pl.BlockSpec((VP, VP), lambda i: (0, 0)),
        ],
        out_specs=pl.BlockSpec((1, 1), lambda i: (i, 0),
                               memory_space=pltpu.MemorySpace.SMEM),
        compiler_params=pltpu.CompilerParams(dimension_semantics=("parallel",)),
        cost_estimate=pl.CostEstimate(
            flops=2 * NP * VP * VP + 8 * NP * VP,
            transcendentals=NP * VP,
            bytes_accessed=4 * (VP * VP + 2 * NP + num_tiles),
        ),
    )(idx_col, tgt_col, table_p)

    return jnp.sum(partial) / jnp.float32(N)


@jax.jit
def _bigram_logits(idx, table):
    B, T = idx.shape
    V = table.shape[0]
    N, VP, TM, NP, num_tiles = _sizes(B, T, V)

    idx_col = _pad_ids(idx.reshape(N), N, NP)
    table_p = _pad_table(table, V, VP)

    logits_p = pl.pallas_call(
        _make_logits_kernel(tm=TM, vp=VP),
        out_shape=jax.ShapeDtypeStruct((NP, VP), jnp.float32),
        grid=(num_tiles,),
        in_specs=[
            pl.BlockSpec((TM, 1), lambda i: (i, 0)),
            pl.BlockSpec((VP, VP), lambda i: (0, 0)),
        ],
        out_specs=pl.BlockSpec((TM, VP), lambda i: (i, 0)),
        compiler_params=pltpu.CompilerParams(dimension_semantics=("parallel",)),
        cost_estimate=pl.CostEstimate(
            flops=2 * NP * VP * VP,
            transcendentals=0,
            bytes_accessed=4 * (VP * VP + NP * VP + NP),
        ),
    )(idx_col, table_p)

    return logits_p[:N, :V].reshape(B, T, V)


def bigram_forward_no_target(idx, table):
    """Matches forward(idx, target=None): returns (logits (B, T, V), None)."""
    return _bigram_logits(idx, table), None


def _reference(idx, target, table):
    B, T = idx.shape
    V = table.shape[0]
    logits = table[idx].reshape(B * T, V)
    tgt = target.reshape(B * T)
    lse = jax.scipy.special.logsumexp(logits, axis=-1)
    picked = jnp.take_along_axis(logits, tgt[:, None], axis=-1)[:, 0]
    return logits, jnp.mean(lse - picked)


if __name__ == "__main__":
    key = jax.random.PRNGKey(0)
    k_tab, k_idx, k_tgt = jax.random.split(key, 3)

    vocab_size = 65          # e.g. tiny-shakespeare character vocab
    B, T = 2, 8

    # Deterministic parameter init (nn.Embedding weight ~ N(0, 1)).
    table = jax.random.normal(k_tab, (vocab_size, vocab_size), dtype=jnp.float32)
    idx = jax.random.randint(k_idx, (B, T), 0, vocab_size, dtype=jnp.int32)
    target = jax.random.randint(k_tgt, (B, T), 0, vocab_size, dtype=jnp.int32)

    ref_logits, ref_loss = _reference(idx, target, table)

    # Full forward (logits + loss), as in PyTorch forward(idx, target).
    logits, loss = bigram_forward(idx, target, table)
    jax.block_until_ready((logits, loss))
    assert logits.shape == (B * T, vocab_size)
    assert jnp.allclose(logits, ref_logits, atol=1e-5)
    assert jnp.allclose(loss, ref_loss, atol=1e-5)

    # Loss-only train-step path (no logits writeback).
    loss_only = bigram_loss(idx, target, table)
    jax.block_until_ready(loss_only)
    assert jnp.allclose(loss_only, ref_loss, atol=1e-5)

    # target=None path: logits (B, T, V), loss None — no cross-entropy work done.
    logits_3d, none_loss = bigram_forward_no_target(idx, table)
    jax.block_until_ready(logits_3d)
    assert logits_3d.shape == (B, T, vocab_size) and none_loss is None
    assert jnp.allclose(logits_3d.reshape(B * T, vocab_size), ref_logits, atol=1e-5)

    # TODO(synk): generate() is a host-side autoregressive torch.multinomial sampling
    # loop; sampling stays outside the kernel (the logits kernel above feeds it).
    print("KERNEL_OK")
</pallas_src>

<mosaic_0001>
module attributes {stable_mosaic.version = 11 : i64} {
  func.func @kernel(%arg0: i32, %arg1: memref<16x1xi32, #tpu.memory_space<vmem>>, %arg2: memref<16x1xi32, #tpu.memory_space<vmem>>, %arg3: memref<128x128xf32, #tpu.memory_space<vmem>>, %arg4: memref<16x128xf32, #tpu.memory_space<vmem>>, %arg5: memref<1x1xf32, #tpu.memory_space<smem>>) attributes {dimension_semantics = [#tpu.dimension_semantics<parallel>], iteration_bounds = array<i64: 1>, scalar_prefetch = 0 : i64, scratch_operands = 0 : i64, tpu.core_type = #tpu.core_type<tc>, window_params = [{transform_indices = @transform_0, window_bounds = array<i64: 16, 1>}, {transform_indices = @transform_1, window_bounds = array<i64: 16, 1>}, {pipeline_mode = #tpu.pipeline_mode<synchronous>, transform_indices = @transform_2, window_bounds = array<i64: 128, 128>}, {transform_indices = @transform_3, window_bounds = array<i64: 16, 128>}, {transform_indices = @transform_4, window_bounds = array<i64: 1, 1>}]} {
    %c0 = arith.constant 0 : index
    %c0_0 = arith.constant 0 : index
    %0 = vector.load %arg1[%c0, %c0_0] : memref<16x1xi32, #tpu.memory_space<vmem>>, vector<16x1xi32>
    %1 = tpu.iota {dimensions = array<i32: 1>} : vector<16x128xi32>
    %2 = vector.broadcast %0 : vector<16x1xi32> to vector<16x128xi32>
    %3 = arith.cmpi eq, %1, %2 : vector<16x128xi32>
    %4 = arith.extui %3 : vector<16x128xi1> to vector<16x128xi32>
    %5 = arith.sitofp %4 : vector<16x128xi32> to vector<16x128xf32>
    %c0_1 = arith.constant 0 : index
    %c0_2 = arith.constant 0 : index
    %6 = vector.load %arg3[%c0_1, %c0_2] : memref<128x128xf32, #tpu.memory_space<vmem>>, vector<128x128xf32>
    %cst = arith.constant dense<0.000000e+00> : vector<16x128xf32>
    %7 = tpu.matmul %5, %6, %cst {dimension_numbers = #tpu.dot_dimension_numbers<[1], [0], [0], [1], [0, 0, 1, 1], [], []>, precision = #tpu.contract_precision<fp32>} : vector<16x128xf32>, vector<128x128xf32>, vector<16x128xf32> -> vector<16x128xf32>
    %c0_3 = arith.constant 0 : index
    %c0_4 = arith.constant 0 : index
    %8 = vector.load %arg4[%c0_3, %c0_4] : memref<16x128xf32, #tpu.memory_space<vmem>>, vector<16x128xf32>
    tpu.vector_store %arg4[%c0_3, %c0_4], %7 {strides = array<i32>} : memref<16x128xf32, #tpu.memory_space<vmem>>, vector<16x128xf32>,
    %cst_5 = arith.constant dense<0xFF800000> : vector<16xf32>
    %9 = vector.multi_reduction <maximumf>, %7, %cst_5 [1] : vector<16x128xf32> to vector<16xf32>
    %10 = vector.shape_cast %9 : vector<16xf32> to vector<16x1xf32>
    %11 = vector.broadcast %10 : vector<16x1xf32> to vector<16x128xf32>
    %12 = arith.subf %7, %11 : vector<16x128xf32>
    %13 = math.exp %12 : vector<16x128xf32>
    %cst_6 = arith.constant dense<0.000000e+00> : vector<16xf32>
    %14 = vector.multi_reduction <add>, %13, %cst_6 [1] : vector<16x128xf32> to vector<16xf32>
    %15 = vector.shape_cast %14 : vector<16xf32> to vector<16x1xf32>
    %16 = math.log %15 : vector<16x1xf32>
    %17 = arith.addf %10, %16 : vector<16x1xf32>
    %c0_7 = arith.constant 0 : index
    %c0_8 = arith.constant 0 : index
    %18 = vector.load %arg2[%c0_7, %c0_8] : memref<16x1xi32, #tpu.memory_space<vmem>>, vector<16x1xi32>
    %19 = vector.broadcast %18 : vector<16x1xi32> to vector<16x128xi32>
    %20 = arith.cmpi eq, %1, %19 : vector<16x128xi32>
    %cst_9 = arith.constant 0.000000e+00 : f32
    %21 = vector.broadcast %cst_9 : f32 to vector<16x128xf32>
    %22 = arith.select %20, %7, %21 : vector<16x128xi1>, vector<16x128xf32>
    %cst_10 = arith.constant dense<0.000000e+00> : vector<16xf32>
    %23 = vector.multi_reduction <add>, %22, %cst_10 [1] : vector<16x128xf32> to vector<16xf32>
    %24 = vector.shape_cast %23 : vector<16xf32> to vector<16x1xf32>
    %25 = tpu.iota {dimensions = array<i32: 0>} : vector<16x1xi32>
    %c16_i32 = arith.constant 16 : i32
    %26 = arith.muli %arg0, %c16_i32 : i32
    %27 = vector.broadcast %26 : i32 to vector<16x1xi32>
    %28 = arith.addi %25, %27 : vector<16x1xi32>
    %c16_i32_11 = arith.constant 16 : i32
    %29 = vector.broadcast %c16_i32_11 : i32 to vector<16x1xi32>
    %30 = arith.cmpi slt, %28, %29 : vector<16x1xi32>
    %31 = arith.subf %17, %24 : vector<16x1xf32>
    %cst_12 = arith.constant 0.000000e+00 : f32
    %32 = vector.broadcast %cst_12 : f32 to vector<16x1xf32>
    %33 = arith.select %30, %31, %32 : vector<16x1xi1>, vector<16x1xf32>
    %34 = vector.shape_cast %33 : vector<16x1xf32> to vector<1x16x1xf32>
    %cst_13 = arith.constant dense<0.000000e+00> : vector<1xf32>
    %35 = vector.multi_reduction <add>, %34, %cst_13 [1, 2] : vector<1x16x1xf32> to vector<1xf32>
    %36 = vector.shape_cast %35 : vector<1xf32> to vector<1x1x1xf32>
    %37 = vector.extract %36[0, 0, 0] : f32 from vector<1x1x1xf32>
    %c0_14 = arith.constant 0 : index
    %c0_15 = arith.constant 0 : index
    %38 = memref.load %arg5[%c0_14, %c0_15] : memref<1x1xf32, #tpu.memory_space<smem>>
    memref.store %37, %arg5[%c0_14, %c0_15] : memref<1x1xf32, #tpu.memory_space<smem>>
    return
  }
  func.func @transform_0(%arg0: i32) -> (i32, i32) {
    %c0_i32 = arith.constant 0 : i32
    %c0_i32_0 = arith.constant 0 : i32
    return %arg0, %c0_i32 : i32, i32
  }
  func.func @transform_1(%arg0: i32) -> (i32, i32) {
    %c0_i32 = arith.constant 0 : i32
    %c0_i32_0 = arith.constant 0 : i32
    return %arg0, %c0_i32 : i32, i32
  }
  func.func @transform_2(%arg0: i32) -> (i32, i32) {
    %c0_i32 = arith.constant 0 : i32
    %c0_i32_0 = arith.constant 0 : i32
    %c0_i32_1 = arith.constant 0 : i32
    return %c0_i32, %c0_i32_0 : i32, i32
  }
  func.func @transform_3(%arg0: i32) -> (i32, i32) {
    %c0_i32 = arith.constant 0 : i32
    %c0_i32_0 = arith.constant 0 : i32
    return %arg0, %c0_i32 : i32, i32
  }
  func.func @transform_4(%arg0: i32) -> (i32, i32) {
    %c0_i32 = arith.constant 0 : i32
    %c0_i32_0 = arith.constant 0 : i32
    return %arg0, %c0_i32 : i32, i32
  }
}

</mosaic_0001>

<bundles_post_ra>
// kernel: bigram_forward.1
= control target key start
LH: loop header
LB: loop body
LE: loop exit
PB: predicated region body
PF: predicated region fallthrough
CT: control target
= control target key end

     0   :  { %10 = vsyncpa [#allocation3], 0  ;;  %v1412_v1 = vmov 0   ;;  %s1802_s0 = inlined_call_operand.vmem [shape: s32[16,1], index: 0, kind: input, shape index: {}]   ;;  %s1803_s1 = inlined_call_operand.vmem [shape: s32[16,1], index: 1, kind: input, shape index: {}]   ;;  %s1804_s2 = inlined_call_operand.vmem [shape: f32[128,128], index: 2, kind: input, shape index: {}]   ;;  %s1805_s3 = inlined_call_operand.hbm [shape: f32[16,128], index: 3, kind: output, shape index: {0}]   ;;  %s1806_s4 = inlined_call_operand.hbm [shape: f32[1,1], index: 4, kind: output, shape index: {1}]  }
   0x1   :  { %v18_v0 = vld [vmem:[%s1802_s0] sm:$0xff]  ;;  %1366 = vset.pattern.permute.xlu0 %v1412_v1  ;;  %v1455_v3 = vld [vmem:[%s1804_s2 + $0x8] sm:$0xff]  ;;  %v36_v4 = vld [vmem:[%s1804_s2 + $0x10] sm:$0xff]  ;;  %1367 = vset.pattern.permute.xlu1 %v1412_v1 }
   0x2   :  { %v1450_v2 = vld [vmem:[%s1804_s2] sm:$0xff]  ;;  %23 = vperm.xlu0 %1366, %v18_v0   ;;  %v54_v6 = vand.u32 4294901760, %v1455_v3  ;;  %v37_v7 = vld [vmem:[%s1804_s2 + $0x18] sm:$0xff]  ;;  %v57_v8 = vand.u32 4294901760, %v36_v4  ;;  %v39_v10 = vld [vmem:[%s1804_s2 + $0x28] sm:$0xff] }
   0x3   :  { %v51_v5 = vand.u32 4294901760, %v1450_v2  ;;  %v38_v9 = vld [vmem:[%s1804_s2 + $0x20] sm:$0xff]  ;;  %v19_v11 = vld [vmem:[%s1802_s0 + $0x8] sm:$0xff]  ;;  %v60_v12 = vand.u32 4294901760, %v37_v7  ;;  %v66_v15 = vand.u32 4294901760, %v39_v10  ;;  %v40_v17 = vld [vmem:[%s1804_s2 + $0x30] sm:$0xff] }
   0x4   :  { %v63_v14 = vand.u32 4294901760, %v38_v9  ;;  %v41_v18 = vld [vmem:[%s1804_s2 + $0x38] sm:$0xff] }
   0x5   :  { %v1474_v13 = vpack.c.bf16 %v54_v6, %v51_v5  ;;  %v1476_v16 = vpack.c.bf16 %v60_v12, %v57_v8 }
   0x6   :  { %26 = vperm.xlu0 %1366, %v19_v11  }
   0x7   :  { %1252 = vmatprep.subr.bf16.mxu0 %v1474_v13 }
   0x8   :  { %11 = vsyncpa [#allocation4], 0  ;;  %v756_v19 = vld [vmem:[%s1803_s1] sm:$0xff]  ;;  %1254 = vmatpush3.bf16.msra.mxu0 %v1474_v13  ;;  %1156 = vmatprep.subr.bf16.mxu1 %v1474_v13  ;;  %v1492_v20 = vpack.c.bf16 %v66_v15, %v63_v14  ;;  %v69_v21 = vand.u32 4294901760, %v40_v17  ;;  %v72_v22 = vand.u32 4294901760, %v41_v18  ;;  %v1501_v24 = vld [vmem:[%s1804_s2 + $0x48] sm:$0xff]  ;;  %v1503_v25 = vsub.f32 %v36_v4, %v57_v8 }
   0x9   :  { %1256 = vmatprep.subr.bf16.mxu0 %v1476_v16  ;;  %1158 = vmatpush3.bf16.msra.mxu1 %v1474_v13  ;;  %v42_v23 = vld [vmem:[%s1804_s2 + $0x40] sm:$0xff]  ;;  %v1505_v26 = vsub.f32 %v37_v7, %v60_v12  ;;  %v78_v29 = vand.u32 4294901760, %v1501_v24  ;;  %v1516_v30 = vld [vmem:[%s1804_s2 + $0x50] sm:$0xff]  ;;  %v1523_v32 = vld [vmem:[%s1804_s2 + $0x58] sm:$0xff]  ;;  %v1527_v35 = vsub.f32 %v38_v9, %v63_v14  ;;  %v1539_v40 = vsub.f32 %v39_v10, %v66_v15 }
   0xa   :  { %1160 = vmatprep.subr.bf16.mxu1 %v1476_v16  ;;  %759 = vperm.xlu0 %1366, %v756_v19   ;;  %v1510_v27 = vpack.c.bf16 %v72_v22, %v69_v21  ;;  %v75_v28 = vand.u32 4294901760, %v42_v23  ;;  %v168_v31 = vand.u32 4294901760, %v1503_v25  ;;  %v81_v36 = vand.u32 4294901760, %v1516_v30  ;;  %v1534_v37 = vld [vmem:[%s1804_s2 + $0x60] sm:$0xff]  ;;  %v1549_v43 = vld [vmem:[%s1804_s2 + $0x68] sm:$0xff]  ;;  %v1580_v59 = vld [vmem:[%s1804_s2 + $0x70] sm:$0xff] }
   0xb   :  { %v175_v33 = vand.u32 4294901760, %v1505_v26  ;;  %v84_v42 = vand.u32 4294901760, %v1523_v32  ;;  %v182_v45 = vand.u32 4294901760, %v1527_v35  ;;  %v1554_v46 = vsub.f32 %v1450_v2, %v51_v5  ;;  %v1585_v60 = vld [vmem:[%s1804_s2 + $0x78] sm:$0xff] }
   0xc   :  { %1258 = vmatpush3.bf16.msra.mxu0 %v1476_v16  ;;  %v169_v34 = vsub.f32 %v1503_v25, %v168_v31  ;;  %v1543_v41 = vpack.c.bf16 %v78_v29, %v75_v28  ;;  %v1557_v47 = vsub.f32 %v1455_v3, %v54_v6  ;;  %v189_v49 = vand.u32 4294901760, %v1539_v40 }
   0xd   :  { %1260 = vmatprep.subr.bf16.mxu0 %v1492_v20  ;;  %1162 = vmatpush3.bf16.msra.mxu1 %v1476_v16  ;;  %v1536_v38 = vpack.c.bf16 %v175_v33, %v168_v31  ;;  %v176_v39 = vsub.f32 %v1505_v26, %v175_v33  ;;  %v87_v50 = vand.u32 4294901760, %v1534_v37  ;;  %v183_v51 = vsub.f32 %v1527_v35, %v182_v45 }
   0xe   :  { %1164 = vmatprep.subr.bf16.mxu1 %v1492_v20  ;;  %v170_v44 = vand.u32 4294901760, %v169_v34  ;;  %v1562_v52 = vsub.f32 %v40_v17, %v69_v21  ;;  %v1564_v53 = vsub.f32 %v41_v18, %v72_v22  ;;  %v90_v54 = vand.u32 4294901760, %v1549_v43 }
   0xf   :  { %v177_v48 = vand.u32 4294901760, %v176_v39  ;;  %v1570_v56 = vpack.c.bf16 %v189_v49, %v182_v45  ;;  %v190_v57 = vsub.f32 %v1539_v40, %v189_v49  ;;  %v1575_v58 = vpack.c.bf16 %v84_v42, %v81_v36 }
  0x10   :  { %1262 = vmatpush3.bf16.msra.mxu0 %v1492_v20  ;;  %v184_v61 = vand.u32 4294901760, %v183_v51  ;;  %v196_v62 = vand.u32 4294901760, %v1562_v52  ;;  %v203_v63 = vand.u32 4294901760, %v1564_v53  ;;  %v154_v0 = vand.u32 4294901760, %v1554_v46 }
  0x11   :  { %1264 = vmatprep.subr.bf16.mxu0 %v1510_v27  ;;  %1166 = vmatpush3.bf16.msra.mxu1 %v1492_v20  ;;  %v1568_v55 = vpack.c.bf16 %v177_v48, %v170_v44  ;;  %v161_v1 = vand.u32 4294901760, %v1557_v47  ;;  %v191_v2 = vand.u32 4294901760, %v190_v57  ;;  %v1596_v6 = vsub.f32 %v42_v23, %v75_v28 }
  0x12   :  { %1168 = vmatprep.subr.bf16.mxu1 %v1510_v27  ;;  %v1592_v3 = vpack.c.bf16 %v203_v63, %v196_v62  ;;  %v197_v4 = vsub.f32 %v1562_v52, %v196_v62  ;;  %v204_v5 = vsub.f32 %v1564_v53, %v203_v63  ;;  %v93_v7 = vand.u32 4294901760, %v1580_v59 }
  0x13   :  { %v96_v8 = vand.u32 4294901760, %v1585_v60  ;;  %v1601_v9 = vpack.c.bf16 %v191_v2, %v184_v61  ;;  %v1604_v10 = vsub.f32 %v1501_v24, %v78_v29  ;;  %v1608_v11 = vpack.c.bf16 %v90_v54, %v87_v50 }
  0x14   :  { %1266 = vmatpush3.bf16.msra.mxu0 %v1510_v27  ;;  %v198_v12 = vand.u32 4294901760, %v197_v4  ;;  %v205_v14 = vand.u32 4294901760, %v204_v5  ;;  %v210_v15 = vand.u32 4294901760, %v1596_v6  ;;  %v155_v17 = vsub.f32 %v1554_v46, %v154_v0 }
  0x15   :  { %1268 = vmatprep.subr.bf16.mxu0 %v1543_v41  ;;  %1170 = vmatpush3.bf16.msra.mxu1 %v1510_v27  ;;  %v162_v18 = vsub.f32 %v1557_v47, %v161_v1  ;;  %v217_v19 = vand.u32 4294901760, %v1604_v10  ;;  %v223_v23 = vsub.f32 %v1516_v30, %v81_v36  ;;  %v230_v24 = vsub.f32 %v1523_v32, %v84_v42 }
  0x16   :  { %1172 = vmatprep.subr.bf16.mxu1 %v1543_v41  ;;  %v1615_v21 = vpack.c.bf16 %v205_v14, %v198_v12  ;;  %v211_v22 = vsub.f32 %v1596_v6, %v210_v15  ;;  %v1626_v31 = vpack.c.bf16 %v96_v8, %v93_v7  ;;  %v156_v30 = vand.u32 4294901760, %v155_v17 }
  0x17   :  { %v1621_v28 = vpack.c.bf16 %v217_v19, %v210_v15  ;;  %v218_v29 = vsub.f32 %v1604_v10, %v217_v19  ;;  %v224_v34 = vand.u32 4294901760, %v223_v23  ;;  %v231_v39 = vand.u32 4294901760, %v230_v24 }
  0x18   :  { %1270 = vmatpush3.bf16.msra.mxu0 %v1543_v41  ;;  %v212_v33 = vand.u32 4294901760, %v211_v22  ;;  %v163_v36 = vand.u32 4294901760, %v162_v18  ;;  %v237_v48 = vsub.f32 %v1534_v37, %v87_v50  ;;  %v244_v51 = vsub.f32 %v1549_v43, %v90_v54 }
  0x19   :  { %1272 = vmatprep.subr.bf16.mxu0 %v1575_v58  ;;  %1174 = vmatpush3.bf16.msra.mxu1 %v1543_v41  ;;  %v219_v32 = vand.u32 4294901760, %v218_v29  ;;  %v1629_v42 = vpack.c.bf16 %v231_v39, %v224_v34  ;;  %v225_v44 = vsub.f32 %v223_v23, %v224_v34  ;;  %v232_v45 = vsub.f32 %v230_v24, %v231_v39 }
  0x1a   :  { %1176 = vmatprep.subr.bf16.mxu1 %v1575_v58  ;;  %v1283_v57 = vpack.c.bf16 %v161_v1, %v154_v0  ;;  %v238_v63 = vand.u32 4294901760, %v237_v48  ;;  %v1187_v2 = vpack.c.bf16 %v163_v36, %v156_v30  ;;  %v245_v4 = vand.u32 4294901760, %v244_v51 }
  0x1b   :  { %v1633_v49 = vpack.c.bf16 %v219_v32, %v212_v33  ;;  %v226_v61 = vand.u32 4294901760, %v225_v44  ;;  %v233_v62 = vand.u32 4294901760, %v232_v45  ;;  %v251_v50 = vsub.f32 %v1580_v59, %v93_v7 }
  0x1c   :  { %1274 = vmatpush3.bf16.msra.mxu0 %v1575_v58  ;;  %v239_v37 = vsub.f32 %v237_v48, %v238_v63  ;;  %v258_v12 = vsub.f32 %v1585_v60, %v96_v8  ;;  %v1644_v43 = vpack.c.bf16 %v245_v4, %v238_v63  ;;  %v246_v54 = vsub.f32 %v244_v51, %v245_v4 }
  0x1d   :  { %1276 = vmatprep.subr.bf16.mxu0 %v1608_v11  ;;  %1178 = vmatpush3.bf16.msra.mxu1 %v1575_v58  ;;  %v1639_v5 = vpack.c.bf16 %v233_v62, %v226_v61  ;;  %v252_v1 = vand.u32 4294901760, %v251_v50  ;;  %v1653_v22 = vpack.c.bf16 %v1557_v47, %v1554_v46  ;;  %v1657_v29 = vpack.c.bf16 %v1505_v26, %v1503_v25 }
  0x1e   :  { %1180 = vmatprep.subr.bf16.mxu1 %v1608_v11  ;;  %v240_v0 = vand.u32 4294901760, %v239_v37  ;;  %v259_v14 = vand.u32 4294901760, %v258_v12  ;;  %v247_v15 = vand.u32 4294901760, %v246_v54  ;;  %v1661_v33 = vpack.c.bf16 %v1539_v40, %v1527_v35 }
  0x1f   :  { %v253_v18 = vsub.f32 %v251_v50, %v252_v1  ;;  %v1665_v34 = vpack.c.bf16 %v1564_v53, %v1562_v52  ;;  %v1669_v39 = vpack.c.bf16 %v1604_v10, %v1596_v6  ;;  %v1671_v30 = vpack.c.bf16 %v230_v24, %v223_v23 }
  0x20   :  { %1278 = vmatpush3.bf16.msra.mxu0 %v1608_v11  ;;  %v1647_v17 = vpack.c.bf16 %v259_v14, %v252_v1  ;;  %v260_v19 = vsub.f32 %v258_v12, %v259_v14  ;;  %v1211_v59 = vpack.c.bf16 %v247_v15, %v240_v0  ;;  %v1673_v46 = vpack.c.bf16 %v244_v51, %v237_v48 }
  0x21   :  { %1280 = vmatprep.subr.bf16.mxu0 %v1626_v31  ;;  %1182 = vmatpush3.bf16.msra.mxu1 %v1608_v11  ;;  %v254_v7 = vand.u32 4294901760, %v253_v18  ;;  %v1675_v47 = vpack.c.bf16 %v258_v12, %v251_v50  ;;  %v20_v25 = vlaneseq  ;;  %v1413_v35 = vmov 0.0  }
  0x22   :  { %1184 = vmatprep.subr.bf16.mxu1 %v1626_v31  ;;  %v261_v60 = vand.u32 4294901760, %v260_v19  ;;  %v1414_v48 = vmov 1.0   ;;  %vm785_vm4 = vcmask 7168  }
  0x23   :  { %v1677_v26 = vand.u32 127, %v20_v25 }
  0x24   :  { %1282 = vmatpush3.bf16.msra.mxu0 %v1626_v31  ;;  %v1649_v8 = vpack.c.bf16 %v261_v60, %v254_v7 }
  0x25   :  { %1284 = vmatprep.subr.bf16.mxu0 %v1283_v57  ;;  %1186 = vmatpush3.bf16.msra.mxu1 %v1626_v31 }
  0x26   :  { %1188 = vmatprep.subr.bf16.mxu1 %v1187_v2 }
  0x81   :  { %v24_v36 = vpop.permute.xlu0 %23 }
  0x82   :  { %vm28_vm0 = vcmp.eq.s32.totalorder %v1677_v26, %v24_v36 }
  0x83   :  { %v829_v40 = vsel %vm28_vm0, 1.0, %v1413_v35 }
  0x84   :  { %v132_v52 = vsub.f32 %v829_v40, %v829_v40 }
  0x85   :  { %v1682_v53 = vpop.permute.xlu0 %26 }
  0x86   :  { %vm29_vm1 = vcmp.eq.s32.totalorder %v1677_v26, %v1682_v53  ;;  %v133_v6 = vand.u32 4294901760, %v132_v52 }
  0x87   :  { %v830_v10 = vsel %vm29_vm1, 1.0, %v1413_v35 }
  0x88   :  { %v1689_v23 = vsub.f32 %v830_v10, %v830_v10  ;;  %1082 = vmatprep.mubr.f32.mxu0 %v133_v6  ;;  %v134_v24 = vsub.f32 %v132_v52, %v133_v6 }
  0x8a   :  { %v135_v32 = vand.u32 4294901760, %v134_v24  ;;  %v143_v44 = vand.u32 4294901760, %v1689_v23 }
  0x8c   :  { %977 = vmatprep.mubr.f32.mxu1 %v135_v32  ;;  %1083 = vmatmul.mubr.f32.vlgmr.msra.gmra.mrb[0].mxu0 %v143_v44  ;;  %v144_v45 = vsub.f32 %v1689_v23, %v143_v44 }
  0x8d   :  { %1286 = vmatpush3.bf16.msra.mxu0 %v1283_v57  ;;  %1117 = vmatprep.mubr.msk.f32.mxu0 %vm28_vm0, %v1414_v48 }
  0x8e   :  { %1288 = vmatprep.subr.bf16.mxu0 %v1536_v38  ;;  %v145_v51 = vand.u32 4294901760, %v144_v45 }
  0x90   :  { %978 = vmatmul.mubr.f32.vlgmr.msra.gmra.mrb[0].mxu1 %v145_v51 }
  0x91   :  { %1190 = vmatpush3.bf16.msra.mxu1 %v1187_v2  ;;  %1290 = vmatpush3.bf16.msra.mxu0 %v1536_v38 }
  0x92   :  { %1012 = vmatprep.mubr.msk.f32.mxu1 %vm28_vm0, %v1414_v48  ;;  %1192 = vmatprep.subr.bf16.mxu1 %v1568_v55 }
  0x93   :  { %1292 = vmatprep.subr.bf16.mxu0 %v1570_v56 }
  0x95   :  { %1194 = vmatpush3.bf16.msra.mxu1 %v1568_v55  ;;  %1294 = vmatpush3.bf16.msra.mxu0 %v1570_v56  ;;  %v757_v55 = vld [vmem:[%s1803_s1 + $0x8] sm:$0xff]  ;;  %s1415_s1 = smov [#allocation2]  }
  0x96   :  { %1196 = vmatprep.subr.bf16.mxu1 %v1601_v9  ;;  %1296 = vmatprep.subr.bf16.mxu0 %v1592_v3  ;;  %s805_s27 = sshll.u32 %s1415_s1, 4  ;;  %s806_s27 = int_to_ptr.vmem [resolvable:$true] %s805_s27 }
  0x97   :  { %s1376_s28 = scalar_lea.vmem %s806_s27, 256  ;;  %p1381_p1 = scmp.lt.s32.totalorder %s806_s27, %s806_s27 }
  0x98   :  { %p1377_p0 = scmp.ne.s32.totalorder %s806_s27, %s1376_s28  ;;  %p1382_p2 = scmp.lt.s32.totalorder %s1376_s28, %s1376_s28 }
  0x99   :  { %1198 = vmatpush3.bf16.msra.mxu1 %v1601_v9  ;;  %1298 = vmatpush3.bf16.msra.mxu0 %v1592_v3 }
  0x9a   :  { %1200 = vmatprep.subr.bf16.mxu1 %v1615_v21  ;;  %1300 = vmatprep.subr.bf16.mxu0 %v1621_v28  ;;  %p1383_p3 = por %p1382_p2, %p1381_p1 }
  0x9c   :  { %p1384_p4 = pnand %p1383_p3, %p1377_p0 }
  0x9d   :  { %1202 = vmatpush3.bf16.msra.mxu1 %v1615_v21  ;;  %1302 = vmatpush3.bf16.msra.mxu0 %v1621_v28 }
  0x9e   :  { %1204 = vmatprep.subr.bf16.mxu1 %v1633_v49  ;;  %1304 = vmatprep.subr.bf16.mxu0 %v1629_v42 }
  0xa1   :  { %1206 = vmatpush3.bf16.msra.mxu1 %v1633_v49  ;;  %1306 = vmatpush3.bf16.msra.mxu0 %v1629_v42  ;;  %v760_v42 = vpop.permute.xlu0 %759 }
  0xa2   :  { %1208 = vmatprep.subr.bf16.mxu1 %v1639_v5  ;;  %1308 = vmatprep.subr.bf16.mxu0 %v1644_v43  ;;  %vm764_vm2 = vcmp.eq.s32.totalorder %v1677_v26, %v760_v42 }
  0xa5   :  { %1210 = vmatpush3.bf16.msra.mxu1 %v1639_v5  ;;  %1310 = vmatpush3.bf16.msra.mxu0 %v1644_v43 }
  0xa6   :  { %1212 = vmatprep.subr.bf16.mxu1 %v1211_v59  ;;  %1312 = vmatprep.subr.bf16.mxu0 %v1647_v17 }
  0xa9   :  { %1214 = vmatpush3.bf16.msra.mxu1 %v1211_v59  ;;  %1314 = vmatpush3.bf16.msra.mxu0 %v1647_v17 }
  0xaa   :  { %1216 = vmatprep.subr.bf16.mxu1 %v1649_v8  ;;  %1316 = vmatprep.subr.bf16.mxu0 %v1474_v13 }
  0xac   :  { %1118 = vmatmul.mubr.msk.f32.vlgmr.msra.gmra.mrb[0].mxu0 %vm29_vm1, %v1414_v48 }
  0xad   :  { %1218 = vmatpush3.bf16.msra.mxu1 %v1649_v8  ;;  %1318 = vmatpush3.bf16.msra.mxu0 %v1474_v13 }
  0xae   :  { %1152 = vmatprep.mubr.msk.f32.mxu0 %vm28_vm0, %v1414_v48  ;;  %1220 = vmatprep.subr.bf16.mxu1 %v1653_v22 }
  0xaf   :  { %1320 = vmatprep.subr.bf16.mxu0 %v1476_v16 }
  0xb0   :  { %1013 = vmatmul.mubr.msk.f32.vlgmr.msra.gmra.mrb[0].mxu1 %vm29_vm1, %v1414_v48 }
  0xb1   :  { %1222 = vmatpush3.bf16.msra.mxu1 %v1653_v22  ;;  %1047 = vmatprep.mubr.f32.mxu1 %v132_v52 }
  0xb2   :  { %1322 = vmatpush3.bf16.msra.mxu0 %v1476_v16  ;;  %1224 = vmatprep.subr.bf16.mxu1 %v1657_v29 }
  0xb3   :  { %1324 = vmatprep.subr.bf16.mxu0 %v1492_v20 }
  0xb5   :  { %1226 = vmatpush3.bf16.msra.mxu1 %v1657_v29 }
  0xb6   :  { %1326 = vmatpush3.bf16.msra.mxu0 %v1492_v20  ;;  %1228 = vmatprep.subr.bf16.mxu1 %v1661_v33 }
  0xb7   :  { %1328 = vmatprep.subr.bf16.mxu0 %v1510_v27 }
  0xb9   :  { %1230 = vmatpush3.bf16.msra.mxu1 %v1661_v33 }
  0xba   :  { %1330 = vmatpush3.bf16.msra.mxu0 %v1510_v27  ;;  %1232 = vmatprep.subr.bf16.mxu1 %v1665_v34 }
  0xbb   :  { %1332 = vmatprep.subr.bf16.mxu0 %v1543_v41 }
  0xbd   :  { %1234 = vmatpush3.bf16.msra.mxu1 %v1665_v34 }
  0xbe   :  { %1334 = vmatpush3.bf16.msra.mxu0 %v1543_v41  ;;  %1236 = vmatprep.subr.bf16.mxu1 %v1669_v39 }
  0xbf   :  { %1336 = vmatprep.subr.bf16.mxu0 %v1575_v58 }
  0xc1   :  { %1238 = vmatpush3.bf16.msra.mxu1 %v1669_v39 }
  0xc2   :  { %1338 = vmatpush3.bf16.msra.mxu0 %v1575_v58  ;;  %1240 = vmatprep.subr.bf16.mxu1 %v1671_v30 }
  0xc3   :  { %1340 = vmatprep.subr.bf16.mxu0 %v1608_v11 }
  0xc5   :  { %1242 = vmatpush3.bf16.msra.mxu1 %v1671_v30 }
  0xc6   :  { %1342 = vmatpush3.bf16.msra.mxu0 %v1608_v11  ;;  %1244 = vmatprep.subr.bf16.mxu1 %v1673_v46 }
  0xc7   :  { %1344 = vmatprep.subr.bf16.mxu0 %v1626_v31 }
  0xc9   :  { %1246 = vmatpush3.bf16.msra.mxu1 %v1673_v46 }
  0xca   :  { %1346 = vmatpush3.bf16.msra.mxu0 %v1626_v31  ;;  %1248 = vmatprep.subr.bf16.mxu1 %v1675_v47 }
  0xcd   :  { %1153 = vmatmul.mubr.msk.f32.vlgmr.msra.gmra.mrb[0].mxu0 %vm29_vm1, %v1414_v48  ;;  %1250 = vmatpush3.bf16.msra.mxu1 %v1675_v47 }
  0xd0   :  { %1048 = vmatmul.mubr.f32.vlgmr.msra.gmra.mrb[0].mxu1 %v1689_v23 }
 0x1a0   :  { %v1154_v13 = vpop.f32.mrb[0].mxu0 }
 0x1a1   :  { %v724_v16 = vpop.f32.mrb[1].mxu0 }
 0x1a3   :  { %v1049_v20 = vpop.f32.mrb[0].mxu1 }
 0x1a4   :  { %v1347_v27 = vadd.f32 %v1154_v13, %v1049_v20  ;;  %v408_v38 = vpop.f32.mrb[1].mxu1 }
 0x1a5   :  { %v1348_v41 = vadd.f32 %v724_v16, %v408_v38 }
 0x1a6   :  { %735 = vst [vmem:[#allocation2 + $0x8] sm:$0xff] %v1347_v27  ;;  %738 = vmax.xlane.f32.xlu1 %v1347_v27 }
 0x1a7   :  { %734 = vst [vmem:[#allocation2] sm:$0xff] %v1348_v41  ;;  %v766_v57 = vsel %vm764_vm2, %v1348_v41, 0.0 }
 0x1aa   :  { %736 = vmax.xlane.f32.xlu1 %v1348_v41 }
 0x1bb   :  { %762 = vperm.xlu1 %1367, %v757_v55  }
 0x233   :  { %v739_v56 = vpop.xlane.xlu1 %738 }
 0x234   :  { %v741_v58 = vsub.f32 %v1347_v27, %v739_v56 }
 0x236   :  { %v744_v3 = vmul.f32 1.442695, %v741_v58 }
 0x237   :  { %v737_v9 = vpop.xlane.xlu1 %736 }
 0x238   :  { %1368 = vpow2.f32 %v744_v3  ;;  %v740_v11 = vsub.f32 %v1348_v41, %v737_v9 }
 0x23a   :  { %v742_v21 = vmul.f32 1.442695, %v740_v11 }
 0x23b   :  { %v763_v49 = vpop.permute.xlu1 %762 }
 0x23c   :  { %1370 = vpow2.f32 %v742_v21  ;;  %vm765_vm3 = vcmp.eq.s32.totalorder %v1677_v26, %v763_v49 }
 0x23d   :  { %v767_v61 = vsel %vm765_vm3, %v1347_v27, 0.0 }
 0x242   :  { %v1369_v28 = vpop.eup %1368 }
 0x243   :  { %748 = vadd.xlane.f32.xlu1 %v1369_v28 }
 0x246   :  { %v1371_v31 = vpop.eup %1370 }
 0x247   :  { %746 = vadd.xlane.f32.xlu0 %v1371_v31 }
 0x24b   :  { %768 = vadd.xlane.f32.xlu0 %v766_v57 }
 0x24f   :  { %770 = vadd.xlane.f32.xlu0 %v767_v61 }
 0x2d0   :  { %v749_v62 = vpop.xlane.xlu1 %748 }
 0x2d1   :  { %1372 = vlog2.f32 %v749_v62 }
 0x2d4   :  { %v747_v63 = vpop.xlane.xlu0 %746 }
 0x2d5   :  { %1374 = vlog2.f32 %v747_v63 }
 0x2d8   :  { %v769_v4 = vpop.xlane.xlu0 %768 }
 0x2db   :  { %v1373_v2 = vpop.eup %1372 }
 0x2dc   :  { %v753_v5 = vmul.f32 0.6931472, %v1373_v2  ;;  %v771_v43 = vpop.xlane.xlu0 %770 }
 0x2de   :  { %v755_v37 = vadd.f32 %v753_v5, %v739_v56 }
 0x2df   :  { %v1375_v50 = vpop.eup %1374 }
 0x2e0   :  { %v751_v12 = vmul.f32 0.6931472, %v1375_v50  ;;  %v782_v0 = vsub.f32 %v755_v37, %v771_v43 }
 0x2e2   :  { %v754_v54 = vadd.f32 %v751_v12, %v737_v9  ;;  %v787_v15 = vsel %vm785_vm4, %v782_v0, 0.0 }
 0x2e4   :  { %v781_v1 = vsub.f32 %v754_v54, %v769_v4 }
 0x2e6   :  { %v786_v14 = vsel %vm785_vm4, %v781_v1, 0.0 }
 0x2e7   :  { %v788_v17 = vadd.f32 %v787_v15, %v786_v14 }
 0x2e9   :  { %789 = vadd.xlane.f32.xlu0 %v788_v17 }
 0x2ea   :  { %1387 = shalt.err (!%p1384_p4)
}
 0x2eb   :  { %s1388_s5 = scalar_lea.hbm %s1805_s3, 256 }
 0x2ec   :  { %p1389_p5 = scmp.ne.s32.totalorder %s1805_s3, %s1388_s5  ;;  %p1392_p6 = scmp.lt.u32.totalorder %s1388_s5, %s1805_s3 }
 0x2ee   :  { %p1394_p7 = pnand %p1392_p6, %p1389_p5 }
 0x2f0   :  { %1397 = shalt.err (!%p1394_p7)
}
 0x2f1   :  { %s1416_s9 = smov 128   ;;  %s1417_s10 = smov 8  }
 0x2f2   :  { %811 = dma.vmem_to_hbm [thread:$0]  %s806_s27, 256, %s1805_s3, [#allocation3], %s1416_s9, %s1416_s9, %s1417_s10  }
 0x2f3   :  { %s1398_s16 = scalar_lea.hbm %s1806_s4, 16 }
 0x2f4   :  { %p1399_p8 = scmp.ne.s32.totalorder %s1806_s4, %s1398_s16  ;;  %p1402_p9 = scmp.lt.u32.totalorder %s1398_s16, %s1806_s4 }
 0x2f6   :  { %p1404_p10 = pnand %p1402_p9, %p1399_p8 }
 0x376   :  { %v790_v18 = vpop.xlane.xlu0 %789 }
 0x377   :  { %v791_v19 = vrot.slane %v790_v18, 4 }
 0x379   :  { %v792_v59 = vadd.f32 %v791_v19, %v790_v18 }
 0x37b   :  { %v793_v7 = vrot.slane %v792_v59, 2 }
 0x37d   :  { %v794_v60 = vadd.f32 %v793_v7, %v792_v59 }
 0x37f   :  { %v795_v8 = vrot.slane %v794_v60, 1 }
 0x381   :  { %v796_v22 = vadd.f32 %v795_v8, %v794_v60 }
 0x383   :  { %1357 = vpush %v796_v22 }
 0x3b4   :  { %s1358_s13 = spop %1357 }
 0x3b5   :  { %799 = sst [smem:[#allocation5]] %s1358_s13 }
 0x3b6   :  { %1407 = shalt.err (!%p1404_p10)
}
 0x3b7   :  { %s1418_s20 = smov [#allocation5]  }
 0x3b8   :  { %819 = dma.smem_to_hbm %s1418_s20, 16, %s1806_s4, [#allocation4]  }
 0x3b9   :  { %1408 = dma.done.wait [#allocation3], 256  }
 0x3ba   :  { %1409 = vsyncadd [#allocation3], 4294967040 }
 0x3bb   :  { %1410 = dma.done.wait [#allocation4], 16  }
 0x3bc   :  { %1411 = vsyncadd [#allocation4], 4294967280 }
 0x3bd   :  { %826 = sfence }
 0x3be   :  { %827 = vsyncpa [#allocation3], 1 }
 0x3bf   :  { %828 = vsyncpa [#allocation4], 1 }

</bundles_post_ra>
